<compile_context>
chip_gen: v6e
topology: v6e:2x2x1
jax: 0.10.0
libtpu: 0.0.40
codegen_flags: <defaults>
</compile_context>

<pallas_src>
import math

import jax
import jax.numpy as jnp
from jax import lax
from jax.experimental import pallas as pl
from jax.experimental.pallas import tpu as pltpu

BN_EPS = 1e-5
LN_EPS = 1e-5


# ----------------------------------------------------------------------------
# small in-kernel helpers (operate on values, zero-padded time shifts)
# ----------------------------------------------------------------------------
def _shift_back(x):
    """rows x[t-1] with a zero row at t=0.   x: (T, B, C)."""
    zero = jnp.zeros_like(x[:1])
    return jnp.concatenate([zero, x[:-1]], axis=0)


def _shift_fwd(x):
    """rows x[t+1] with a zero row at t=T-1. x: (T, B, C)."""
    zero = jnp.zeros_like(x[:1])
    return jnp.concatenate([x[1:], zero], axis=0)


# ----------------------------------------------------------------------------
# 1) ConvEmbedding2 (+ fused positional-encoding add)
# ----------------------------------------------------------------------------
def conv_embedding2_kernel(x_ref, w1c_ref, g1_ref, b1_ref, w2c_ref, bias2_ref,
                           pe_ref, o_ref):
    # x_ref:    (T, B, D)  f32   input sequence, channel-last
    # w1c_ref:  (3*D, E)   bf16  conv1 im2col weights (taps k=0,1,2 stacked)
    # g1/b1:    (1, E)     f32   BatchNorm gamma / beta
    # w2c_ref:  (3*E, E)   bf16  conv2 (stride 2) im2col weights
    # bias2:    (1, E)     f32   conv2 bias
    # pe_ref:   (T//2,1,E) f32   positional encoding slab
    # o_ref:    (T//2,B,E) f32
    T, B, D = x_ref.shape
    To = o_ref.shape[0]
    E = o_ref.shape[-1]

    x = x_ref[...]
    # --- Conv1d #1 (k=3, s=1, p=1, no bias): single im2col matmul, K = 3*D
    xi = jnp.concatenate([_shift_back(x), x, _shift_fwd(x)], axis=-1)   # (T,B,3D)
    xi2 = xi.reshape(T * B, 3 * D).astype(jnp.bfloat16)
    h = jnp.dot(xi2, w1c_ref[...], preferred_element_type=jnp.float32)  # (T*B, E)

    # --- BatchNorm1d (training-mode batch stats), one-pass sum / sum-of-squares
    n = T * B
    s = jnp.sum(h, axis=0, keepdims=True)
    ss = jnp.sum(h * h, axis=0, keepdims=True)
    mean = s * (1.0 / n)
    var = jnp.maximum(ss * (1.0 / n) - mean * mean, 0.0)
    scale = g1_ref[...] * lax.rsqrt(var + BN_EPS)
    shift = b1_ref[...] - mean * scale
    h = jnp.maximum(h * scale + shift, 0.0)                             # ReLU

    # --- Conv1d #2 (k=3, stride=2, p=1, bias): stride-2 taps via even/odd split
    h3 = h.reshape(To, 2, B, E)
    h_even = h3[:, 0]                                   # time 2t     (tap k=1)
    h_odd = h3[:, 1]                                    # time 2t+1   (tap k=2)
    h_left = jnp.concatenate([jnp.zeros_like(h_odd[:1]), h_odd[:-1]],
                             axis=0)                    # time 2t-1   (tap k=0)
    hi = jnp.concatenate([h_left, h_even, h_odd], axis=-1)              # (To,B,3E)
    hi2 = hi.reshape(To * B, 3 * E).astype(jnp.bfloat16)
    y = jnp.dot(hi2, w2c_ref[...], preferred_element_type=jnp.float32)
    y = (y + bias2_ref[...]).reshape(To, B, E)

    # --- fused PositionalEncoderA (dropout = identity)
    o_ref[...] = (y + pe_ref[...]).astype(o_ref.dtype)


def conv_embedding2_forward(seq, p, pe):
    """seq: (T, B, D) -> (T//2, B, E) with the positional encoding already added."""
    T, B, D = seq.shape
    E = p["w1"].shape[0]
    assert T % 2 == 0, "kernel assumes an even sequence length"
    To = T // 2

    w1c = jnp.concatenate([p["w1"][:, :, k].T for k in range(3)],
                          axis=0).astype(jnp.bfloat16)                  # (3D, E)
    w2c = jnp.concatenate([p["w2"][:, :, k].T for k in range(3)],
                          axis=0).astype(jnp.bfloat16)                  # (3E, E)
    vmem = pl.BlockSpec(memory_space=pltpu.MemorySpace.VMEM)
    return pl.pallas_call(
        conv_embedding2_kernel,
        out_shape=jax.ShapeDtypeStruct((To, B, E), jnp.float32),
        in_specs=[vmem] * 7,
        out_specs=vmem,
        compiler_params=pltpu.CompilerParams(vmem_limit_bytes=32 * 1024 * 1024),
    )(seq.astype(jnp.float32), w1c,
      p["bn_g"].reshape(1, E), p["bn_b"].reshape(1, E),
      w2c, p["b2"].reshape(1, E), pe[:To].astype(jnp.float32))


# ----------------------------------------------------------------------------
# 2) TransformerEncoderLayer2 (pre-norm), one batch element per grid step
# ----------------------------------------------------------------------------
def make_encoder_layer_kernel(n_head):
    def kernel(x_ref, ln1g_ref, ln1b_ref, wq_ref, bq_ref, wk_ref, bk_ref,
               wv_ref, bv_ref, wo_ref, bo_ref, ln2g_ref, ln2b_ref,
               w1_ref, b1_ref, w2_ref, b2_ref, o_ref):
        E = x_ref.shape[2]
        hd = E // n_head
        inv_sqrt_hd = 1.0 / math.sqrt(hd)

        x = x_ref[0]                                        # (T, E) f32

        # --- LayerNorm 1
        mu = jnp.mean(x, axis=-1, keepdims=True)
        xc = x - mu
        var = jnp.mean(xc * xc, axis=-1, keepdims=True)
        xn = xc * lax.rsqrt(var + LN_EPS) * ln1g_ref[...] + ln1b_ref[...]

        # --- q, k, v projections (bf16 MXU, f32 accumulation)
        xb = xn.astype(jnp.bfloat16)
        q = jnp.dot(xb, wq_ref[...], preferred_element_type=jnp.float32) + bq_ref[...]
        k = jnp.dot(xb, wk_ref[...], preferred_element_type=jnp.float32) + bk_ref[...]
        v = jnp.dot(xb, wv_ref[...], preferred_element_type=jnp.float32) + bv_ref[...]
        kT = k.T                                            # (E, T), transposed once

        # --- multi-head self-attention (per-head 2-D matmuls)
        ctx_heads = []
        for hh in range(n_head):
            lo, hi = hh * hd, (hh + 1) * hd
            q_h = q[:, lo:hi].astype(jnp.bfloat16)          # (T, hd)
            k_hT = kT[lo:hi, :].astype(jnp.bfloat16)        # (hd, T)
            v_h = v[:, lo:hi].astype(jnp.bfloat16)          # (T, hd)
            s = jnp.dot(q_h, k_hT,
                        preferred_element_type=jnp.float32) * inv_sqrt_hd
            s = s - jnp.max(s, axis=-1, keepdims=True)
            p = jnp.exp(s)
            p = p / jnp.sum(p, axis=-1, keepdims=True)
            ctx_heads.append(jnp.dot(p.astype(jnp.bfloat16), v_h,
                                     preferred_element_type=jnp.float32))
        ctx = jnp.concatenate(ctx_heads, axis=-1)           # (T, E)
        attn = jnp.dot(ctx.astype(jnp.bfloat16), wo_ref[...],
                       preferred_element_type=jnp.float32) + bo_ref[...]
        x = x + attn                                        # residual (dropout=identity)

        # --- FFN: LayerNorm 2 -> Linear -> ReLU -> Linear, residual
        mu2 = jnp.mean(x, axis=-1, keepdims=True)
        xc2 = x - mu2
        var2 = jnp.mean(xc2 * xc2, axis=-1, keepdims=True)
        x2 = xc2 * lax.rsqrt(var2 + LN_EPS) * ln2g_ref[...] + ln2b_ref[...]
        h1 = jnp.maximum(
            jnp.dot(x2.astype(jnp.bfloat16), w1_ref[...],
                    preferred_element_type=jnp.float32) + b1_ref[...], 0.0)
        y = jnp.dot(h1.astype(jnp.bfloat16), w2_ref[...],
                    preferred_element_type=jnp.float32) + b2_ref[...]
        x = x + y

        o_ref[0] = x.astype(o_ref.dtype)

    return kernel


def encoder_layer_forward(x_bte, p, n_head):
    """x_bte: (B, T, E) -> (B, T, E), one TransformerEncoderLayer2."""
    B, T, E = x_bte.shape
    F = p["w1"].shape[0]
    bf = jnp.bfloat16

    def full(shape):
        return pl.BlockSpec(shape, lambda b: (0, 0))

    in_specs = [
        pl.BlockSpec((1, T, E), lambda b: (b, 0, 0)),
        full((1, E)), full((1, E)),
        full((E, E)), full((1, E)),
        full((E, E)), full((1, E)),
        full((E, E)), full((1, E)),
        full((E, E)), full((1, E)),
        full((1, E)), full((1, E)),
        full((E, F)), full((1, F)),
        full((F, E)), full((1, E)),
    ]
    return pl.pallas_call(
        make_encoder_layer_kernel(n_head),
        grid=(B,),
        out_shape=jax.ShapeDtypeStruct((B, T, E), jnp.float32),
        in_specs=in_specs,
        out_specs=pl.BlockSpec((1, T, E), lambda b: (b, 0, 0)),
        compiler_params=pltpu.CompilerParams(dimension_semantics=("parallel",)),
    )(x_bte,
      p["ln1_g"].reshape(1, E), p["ln1_b"].reshape(1, E),
      p["wq"].T.astype(bf), p["bq"].reshape(1, E),
      p["wk"].T.astype(bf), p["bk"].reshape(1, E),
      p["wv"].T.astype(bf), p["bv"].reshape(1, E),
      p["wo"].T.astype(bf), p["bo"].reshape(1, E),
      p["ln2_g"].reshape(1, E), p["ln2_b"].reshape(1, E),
      p["w1"].T.astype(bf), p["b1"].reshape(1, F),
      p["w2"].T.astype(bf), p["b2"].reshape(1, E))


# ----------------------------------------------------------------------------
# 3) ConvUpdecoding
# ----------------------------------------------------------------------------
def conv_updecoding_kernel(z_ref, wt0_ref, wt1_ref, g_ref, b_ref, w3c_ref,
                           bias3_ref, o_ref):
    # z_ref:    (To, B, E) f32   ; wt0/wt1: (E, E) bf16 (ConvTranspose taps k=0/1)
    # g/b:      (1, E)     f32   ; w3c: (3*E, D) bf16 ; bias3: (1, D) f32
    # o_ref:    (2*To, B, D) f32
    To, B, E = z_ref.shape
    T = 2 * To
    D = o_ref.shape[-1]

    # --- ConvTranspose1d (k=2, stride=2, no bias): two matmuls + time interleave
    z2 = z_ref[...].reshape(To * B, E).astype(jnp.bfloat16)
    u0 = jnp.dot(z2, wt0_ref[...], preferred_element_type=jnp.float32)  # -> out[2t]
    u1 = jnp.dot(z2, wt1_ref[...], preferred_element_type=jnp.float32)  # -> out[2t+1]
    up = jnp.stack([u0.reshape(To, B, E), u1.reshape(To, B, E)], axis=1)
    up = up.reshape(T, B, E)

    # --- BatchNorm1d (training-mode batch stats, one pass) + ReLU
    n = T * B
    s = jnp.sum(up, axis=(0, 1), keepdims=True)
    ss = jnp.sum(up * up, axis=(0, 1), keepdims=True)
    mean = s * (1.0 / n)
    var = jnp.maximum(ss * (1.0 / n) - mean * mean, 0.0)
    scale = g_ref[...].reshape(1, 1, E) * lax.rsqrt(var + BN_EPS)
    shift = b_ref[...].reshape(1, 1, E) - mean * scale
    up = jnp.maximum(up * scale + shift, 0.0)

    # --- Conv1d (E -> D, k=3, s=1, p=1, bias): single im2col matmul
    ui = jnp.concatenate([_shift_back(up), up, _shift_fwd(up)], axis=-1)  # (T,B,3E)
    ui2 = ui.reshape(T * B, 3 * E).astype(jnp.bfloat16)
    y = jnp.dot(ui2, w3c_ref[...], preferred_element_type=jnp.float32) + bias3_ref[...]
    o_ref[...] = y.reshape(T, B, D).astype(o_ref.dtype)


def conv_updecoding_forward(z, p):
    """z: (T//2, B, E) -> (T, B, D)."""
    To, B, E = z.shape
    D = p["w3"].shape[0]
    T = 2 * To
    wt0 = p["wt"][:, :, 0].astype(jnp.bfloat16)                         # (E_in, E_out)
    wt1 = p["wt"][:, :, 1].astype(jnp.bfloat16)
    w3c = jnp.concatenate([p["w3"][:, :, k].T for k in range(3)],
                          axis=0).astype(jnp.bfloat16)                  # (3E, D)
    vmem = pl.BlockSpec(memory_space=pltpu.MemorySpace.VMEM)
    return pl.pallas_call(
        conv_updecoding_kernel,
        out_shape=jax.ShapeDtypeStruct((T, B, D), jnp.float32),
        in_specs=[vmem] * 7,
        out_specs=vmem,
        compiler_params=pltpu.CompilerParams(vmem_limit_bytes=32 * 1024 * 1024),
    )(z.astype(jnp.float32), wt0, wt1,
      p["bn_g"].reshape(1, E), p["bn_b"].reshape(1, E),
      w3c, p["b3"].reshape(1, D))


# ----------------------------------------------------------------------------
# full SimpleTransAutoenc forward
# ----------------------------------------------------------------------------
def simple_trans_autoenc_forward(seq, params, n_head):
    emb = conv_embedding2_forward(seq, params["embed"], params["pe"])   # (T/2,B,E)
    x = jnp.transpose(emb, (1, 0, 2))                                   # (B,T/2,E)
    for lp in params["layers"]:
        x = encoder_layer_forward(x, lp, n_head)
    feats = jnp.transpose(x, (1, 0, 2))                                 # (T/2,B,E)
    return conv_updecoding_forward(feats, params["recon"])              # (T,B,D)


# ----------------------------------------------------------------------------
# independent pure-JAX reference (same precision policy: bf16 operands, f32 acc)
# ----------------------------------------------------------------------------
def reference_forward(seq, params, n_head):
    f32, bf = jnp.float32, jnp.bfloat16
    T, B, D = seq.shape
    pe = params["pe"]

    def conv1d(x_ncl, w, stride, bias=None):
        y = lax.conv_general_dilated(
            x_ncl.astype(bf), w.astype(bf), window_strides=(stride,),
            padding=[(1, 1)], dimension_numbers=("NCH", "OIH", "NCH"),
            preferred_element_type=f32)
        if bias is not None:
            y = y + bias[None, :, None]
        return y

    def batchnorm(x_ncl, g, b):
        mean = jnp.mean(x_ncl, axis=(0, 2), keepdims=True)
        var = jnp.mean(jnp.square(x_ncl - mean), axis=(0, 2), keepdims=True)
        return ((x_ncl - mean) * lax.rsqrt(var + BN_EPS)
                * g[None, :, None] + b[None, :, None])

    def layer_norm(x, g, b):
        mu = jnp.mean(x, axis=-1, keepdims=True)
        xc = x - mu
        var = jnp.mean(xc * xc, axis=-1, keepdims=True)
        return xc * lax.rsqrt(var + LN_EPS) * g + b

    def linear(x, w, b):  # x: (..., in), w: (out, in)
        return jnp.einsum("...i,oi->...o", x.astype(bf), w.astype(bf),
                          preferred_element_type=f32) + b

    # --- ConvEmbedding2
    emb_p = params["embed"]
    x = jnp.transpose(seq, (1, 2, 0)).astype(f32)                       # (B, D, T)
    h = conv1d(x, emb_p["w1"], 1)
    h = jnp.maximum(batchnorm(h, emb_p["bn_g"], emb_p["bn_b"]), 0.0)
    y = conv1d(h, emb_p["w2"], 2, emb_p["b2"])                          # (B, E, T/2)
    emb = jnp.transpose(y, (2, 0, 1))                                   # (T/2, B, E)

    # --- PositionalEncoderA (dropout = identity)
    src = emb + pe[: emb.shape[0]]
    E = src.shape[-1]
    hd = E // n_head

    # --- TransformerEncoderLayer2 stack
    for lp in params["layers"]:
        x2 = layer_norm(src, lp["ln1_g"], lp["ln1_b"])
        q = linear(x2, lp["wq"], lp["bq"])
        k = linear(x2, lp["wk"], lp["bk"])
        v = linear(x2, lp["wv"], lp["bv"])
        S, Bb = q.shape[0], q.shape[1]
        qh = q.reshape(S, Bb, n_head, hd)
        kh = k.reshape(S, Bb, n_head, hd)
        vh = v.reshape(S, Bb, n_head, hd)
        scores = jnp.einsum("tbhd,sbhd->bhts", qh.astype(bf), kh.astype(bf),
                            preferred_element_type=f32) / math.sqrt(hd)
        p = jax.nn.softmax(scores, axis=-1)
        ctx = jnp.einsum("bhts,sbhd->tbhd", p.astype(bf), vh.astype(bf),
                         preferred_element_type=f32).reshape(S, Bb, E)
        src = src + linear(ctx, lp["wo"], lp["bo"])
        x3 = layer_norm(src, lp["ln2_g"], lp["ln2_b"])
        h1 = jnp.maximum(linear(x3, lp["w1"], lp["b1"]), 0.0)
        src = src + linear(h1, lp["w2"], lp["b2"])

    # --- ConvUpdecoding
    pr = params["recon"]
    z = jnp.transpose(src, (1, 2, 0))                                   # (B, E, T/2)
    To = z.shape[-1]
    u = jnp.einsum("bct,cok->botk", z.astype(bf), pr["wt"].astype(bf),
                   preferred_element_type=f32).reshape(B, E, 2 * To)
    u = jnp.maximum(batchnorm(u, pr["bn_g"], pr["bn_b"]), 0.0)
    y = conv1d(u, pr["w3"], 1, pr["b3"])                                # (B, D, T)
    return jnp.transpose(y, (2, 0, 1))                                  # (T, B, D)


# ----------------------------------------------------------------------------
if __name__ == "__main__":
    T, B, D = 8, 8, 4             # sequence length, batch, input dim
    E, H, F, L = 32, 4, 64, 2     # d_model, n_head, d_feedforward, n_layers
    LENGTH = 16                   # PositionalEncoderA max length

    key = jax.random.PRNGKey(0)
    ks = iter(jax.random.split(key, 64))

    def nrm(shape, s):
        return s * jax.random.normal(next(ks), shape, dtype=jnp.float32)

    # PositionalEncoderA buffer (length, 1, d_model)
    row = jnp.arange(LENGTH, dtype=jnp.float32)[:, None] / LENGTH
    col = jnp.linspace(5.0, 1.0, E, dtype=jnp.float32)[None, :]
    pe = jnp.sin(2.0 * math.pi * row * col)[:, None, :]

    def layer_params():
        return {
            "ln1_g": 1.0 + nrm((E,), 0.1), "ln1_b": nrm((E,), 0.1),
            "wq": nrm((E, E), 0.1), "bq": nrm((E,), 0.05),
            "wk": nrm((E, E), 0.1), "bk": nrm((E,), 0.05),
            "wv": nrm((E, E), 0.1), "bv": nrm((E,), 0.05),
            "wo": nrm((E, E), 0.1), "bo": nrm((E,), 0.05),
            "ln2_g": 1.0 + nrm((E,), 0.1), "ln2_b": nrm((E,), 0.1),
            "w1": nrm((F, E), 0.1), "b1": nrm((F,), 0.05),
            "w2": nrm((E, F), 0.1), "b2": nrm((E,), 0.05),
        }

    params = {
        "embed": {
            "w1": nrm((E, D, 3), 0.25),            # Conv1d(D->E), no bias
            "bn_g": 1.0 + nrm((E,), 0.1), "bn_b": nrm((E,), 0.1),
            "w2": nrm((E, E, 3), 0.1), "b2": nrm((E,), 0.1),
        },
        "pe": pe,
        "layers": [layer_params() for _ in range(L)],
        "recon": {
            "wt": nrm((E, E, 2), 0.1),             # ConvTranspose1d(E->E), no bias
            "bn_g": 1.0 + nrm((E,), 0.1), "bn_b": nrm((E,), 0.1),
            "w3": nrm((D, E, 3), 0.1), "b3": nrm((D,), 0.05),
        },
    }

    seq = jax.random.normal(next(ks), (T, B, D), dtype=jnp.float32)

    out = jax.block_until_ready(simple_trans_autoenc_forward(seq, params, H))
    ref = jax.block_until_ready(reference_forward(seq, params, H))

    assert out.shape == (T, B, D), out.shape
    err = float(jnp.max(jnp.abs(out - ref)))
    # Tolerance sized for an end-to-end bf16-operand / f32-accumulation pipeline
    # compared against an independently written reference (operand-rounding
    # differences at bf16 cast points dominate; any real bug is >> 1e-1).
    assert jnp.allclose(out, ref, atol=1e-2, rtol=1e-2), f"max|diff|={err}"
    print("KERNEL_OK")
</pallas_src>

<mosaic_0001>
module attributes {stable_mosaic.version = 11 : i64} {
  func.func @conv_embedding2_kernel(%arg0: memref<8x8x4xf32, #tpu.memory_space<vmem>>, %arg1: memref<12x32xbf16, #tpu.memory_space<vmem>>, %arg2: memref<1x32xf32, #tpu.memory_space<vmem>>, %arg3: memref<1x32xf32, #tpu.memory_space<vmem>>, %arg4: memref<96x32xbf16, #tpu.memory_space<vmem>>, %arg5: memref<1x32xf32, #tpu.memory_space<vmem>>, %arg6: memref<4x1x32xf32, #tpu.memory_space<vmem>>, %arg7: memref<4x8x32xf32, #tpu.memory_space<vmem>>) attributes {dimension_semantics = [], scalar_prefetch = 0 : i64, scratch_operands = 0 : i64, tpu.core_type = #tpu.core_type<tc>} {
    %c0 = arith.constant 0 : index
    %c0_0 = arith.constant 0 : index
    %c0_1 = arith.constant 0 : index
    %0 = vector.load %arg0[%c0, %c0_0, %c0_1] : memref<8x8x4xf32, #tpu.memory_space<vmem>>, vector<8x8x4xf32>
    %cst = arith.constant 0.000000e+00 : f32
    %1 = vector.broadcast %cst : f32 to vector<1x8x4xf32>
    %2 = vector.extract_strided_slice %0 {offsets = [0, 0, 0], sizes = [7, 8, 4], strides = [1, 1, 1]} : vector<8x8x4xf32> to vector<7x8x4xf32>
    %3 = tpu.concatenate %1, %2 in 0 : vector<1x8x4xf32>, vector<7x8x4xf32> -> vector<8x8x4xf32>
    %cst_2 = arith.constant 0.000000e+00 : f32
    %4 = vector.broadcast %cst_2 : f32 to vector<1x8x4xf32>
    %5 = vector.extract_strided_slice %0 {offsets = [1, 0, 0], sizes = [7, 8, 4], strides = [1, 1, 1]} : vector<8x8x4xf32> to vector<7x8x4xf32>
    %6 = tpu.concatenate %5, %4 in 0 : vector<7x8x4xf32>, vector<1x8x4xf32> -> vector<8x8x4xf32>
    %7 = tpu.concatenate %3, %0, %6 in 2 : vector<8x8x4xf32>, vector<8x8x4xf32>, vector<8x8x4xf32> -> vector<8x8x12xf32>
    %8 = vector.shape_cast %7 : vector<8x8x12xf32> to vector<64x12xf32>
    %9 = arith.truncf %8 : vector<64x12xf32> to vector<64x12xbf16>
    %c0_3 = arith.constant 0 : index
    %c0_4 = arith.constant 0 : index
    %10 = vector.load %arg1[%c0_3, %c0_4] : memref<12x32xbf16, #tpu.memory_space<vmem>>, vector<12x32xbf16>
    %cst_5 = arith.constant dense<0.000000e+00> : vector<64x32xf32>
    %11 = tpu.matmul %9, %10, %cst_5 {dimension_numbers = #tpu.dot_dimension_numbers<[1], [0], [0], [1], [0, 0, 1, 1], [], []>} : vector<64x12xbf16>, vector<12x32xbf16>, vector<64x32xf32> -> vector<64x32xf32>
    %cst_6 = arith.constant dense<0.000000e+00> : vector<32xf32>
    %12 = vector.multi_reduction <add>, %11, %cst_6 [0] : vector<64x32xf32> to vector<32xf32>
    %13 = vector.shape_cast %12 : vector<32xf32> to vector<1x32xf32>
    %14 = arith.mulf %11, %11 : vector<64x32xf32>
    %cst_7 = arith.constant dense<0.000000e+00> : vector<32xf32>
    %15 = vector.multi_reduction <add>, %14, %cst_7 [0] : vector<64x32xf32> to vector<32xf32>
    %16 = vector.shape_cast %15 : vector<32xf32> to vector<1x32xf32>
    %cst_8 = arith.constant 1.562500e-02 : f32
    %17 = vector.broadcast %cst_8 : f32 to vector<1x32xf32>
    %18 = arith.mulf %13, %17 : vector<1x32xf32>
    %cst_9 = arith.constant 1.562500e-02 : f32
    %19 = vector.broadcast %cst_9 : f32 to vector<1x32xf32>
    %20 = arith.mulf %16, %19 : vector<1x32xf32>
    %21 = arith.mulf %18, %18 : vector<1x32xf32>
    %22 = arith.subf %20, %21 : vector<1x32xf32>
    %cst_10 = arith.constant 0.000000e+00 : f32
    %23 = vector.broadcast %cst_10 : f32 to vector<1x32xf32>
    %24 = arith.maximumf %22, %23 : vector<1x32xf32>
    %c0_11 = arith.constant 0 : index
    %c0_12 = arith.constant 0 : index
    %25 = vector.load %arg2[%c0_11, %c0_12] : memref<1x32xf32, #tpu.memory_space<vmem>>, vector<1x32xf32>
    %cst_13 = arith.constant 9.99999974E-6 : f32
    %26 = vector.broadcast %cst_13 : f32 to vector<1x32xf32>
    %27 = arith.addf %24, %26 : vector<1x32xf32>
    %28 = math.rsqrt %27 : vector<1x32xf32>
    %29 = arith.mulf %25, %28 : vector<1x32xf32>
    %c0_14 = arith.constant 0 : index
    %c0_15 = arith.constant 0 : index
    %30 = vector.load %arg3[%c0_14, %c0_15] : memref<1x32xf32, #tpu.memory_space<vmem>>, vector<1x32xf32>
    %31 = arith.mulf %18, %29 : vector<1x32xf32>
    %32 = arith.subf %30, %31 : vector<1x32xf32>
    %33 = vector.broadcast %29 : vector<1x32xf32> to vector<64x32xf32>
    %34 = arith.mulf %11, %33 : vector<64x32xf32>
    %35 = vector.broadcast %32 : vector<1x32xf32> to vector<64x32xf32>
    %36 = arith.addf %34, %35 : vector<64x32xf32>
    %cst_16 = arith.constant 0.000000e+00 : f32
    %37 = vector.broadcast %cst_16 : f32 to vector<64x32xf32>
    %38 = arith.maximumf %36, %37 : vector<64x32xf32>
    %39 = vector.shape_cast %38 : vector<64x32xf32> to vector<4x2x8x32xf32>
    %40 = vector.extract_strided_slice %39 {offsets = [0, 0, 0, 0], sizes = [4, 1, 8, 32], strides = [1, 1, 1, 1]} : vector<4x2x8x32xf32> to vector<4x1x8x32xf32>
    %41 = vector.shape_cast %40 : vector<4x1x8x32xf32> to vector<4x8x32xf32>
    %42 = vector.extract_strided_slice %39 {offsets = [0, 1, 0, 0], sizes = [4, 1, 8, 32], strides = [1, 1, 1, 1]} : vector<4x2x8x32xf32> to vector<4x1x8x32xf32>
    %43 = vector.shape_cast %42 : vector<4x1x8x32xf32> to vector<4x8x32xf32>
    %cst_17 = arith.constant 0.000000e+00 : f32
    %44 = vector.broadcast %cst_17 : f32 to vector<1x8x32xf32>
    %45 = vector.extract_strided_slice %43 {offsets = [0, 0, 0], sizes = [3, 8, 32], strides = [1, 1, 1]} : vector<4x8x32xf32> to vector<3x8x32xf32>
    %46 = tpu.concatenate %44, %45 in 0 : vector<1x8x32xf32>, vector<3x8x32xf32> -> vector<4x8x32xf32>
    %47 = tpu.concatenate %46, %41, %43 in 2 : vector<4x8x32xf32>, vector<4x8x32xf32>, vector<4x8x32xf32> -> vector<4x8x96xf32>
    %48 = vector.shape_cast %47 : vector<4x8x96xf32> to vector<32x96xf32>
    %49 = arith.truncf %48 : vector<32x96xf32> to vector<32x96xbf16>
    %c0_18 = arith.constant 0 : index
    %c0_19 = arith.constant 0 : index
    %50 = vector.load %arg4[%c0_18, %c0_19] : memref<96x32xbf16, #tpu.memory_space<vmem>>, vector<96x32xbf16>
    %cst_20 = arith.constant dense<0.000000e+00> : vector<32x32xf32>
    %51 = tpu.matmul %49, %50, %cst_20 {dimension_numbers = #tpu.dot_dimension_numbers<[1], [0], [0], [1], [0, 0, 1, 1], [], []>} : vector<32x96xbf16>, vector<96x32xbf16>, vector<32x32xf32> -> vector<32x32xf32>
    %c0_21 = arith.constant 0 : index
    %c0_22 = arith.constant 0 : index
    %52 = vector.load %arg5[%c0_21, %c0_22] : memref<1x32xf32, #tpu.memory_space<vmem>>, vector<1x32xf32>
    %53 = vector.broadcast %52 : vector<1x32xf32> to vector<32x32xf32>
    %54 = arith.addf %51, %53 : vector<32x32xf32>
    %55 = vector.shape_cast %54 : vector<32x32xf32> to vector<4x8x32xf32>
    %c0_23 = arith.constant 0 : index
    %c0_24 = arith.constant 0 : index
    %c0_25 = arith.constant 0 : index
    %56 = vector.load %arg6[%c0_23, %c0_24, %c0_25] : memref<4x1x32xf32, #tpu.memory_space<vmem>>, vector<4x1x32xf32>
    %57 = vector.broadcast %56 : vector<4x1x32xf32> to vector<4x8x32xf32>
    %58 = arith.addf %55, %57 : vector<4x8x32xf32>
    %c0_26 = arith.constant 0 : index
    %c0_27 = arith.constant 0 : index
    %c0_28 = arith.constant 0 : index
    %59 = vector.load %arg7[%c0_26, %c0_27, %c0_28] : memref<4x8x32xf32, #tpu.memory_space<vmem>>, vector<4x8x32xf32>
    tpu.vector_store %arg7[%c0_26, %c0_27, %c0_28], %58 {strides = array<i32>} : memref<4x8x32xf32, #tpu.memory_space<vmem>>, vector<4x8x32xf32>,
    return
  }
}

</mosaic_0001>

<bundles_post_ra>
// kernel: tpu_custom_call.1
= control target key start
LH: loop header
LB: loop body
LE: loop exit
PB: predicated region body
PF: predicated region fallthrough
CT: control target
= control target key end

     0   :  { %vm135_vm0 = vcmask 1045504   ;;  %s665_s17 = smov 8   ;;  %s666_s18 = smov 4   ;;  %s880_s0 = inlined_call_operand.vmem [shape: f32[8,8,4], index: 0, kind: input, shape index: {}]   ;;  %s881_s1 = inlined_call_operand.vmem [shape: bf16[12,32], index: 1, kind: input, shape index: {}]   ;;  %s882_s2 = inlined_call_operand.vmem [shape: f32[1,32], index: 2, kind: input, shape index: {}]   ;;  %s883_s3 = inlined_call_operand.vmem [shape: f32[1,32], index: 3, kind: input, shape index: {}]   ;;  %s884_s4 = inlined_call_operand.vmem [shape: bf16[96,32], index: 4, kind: input, shape index: {}]   ;;  %s885_s5 = inlined_call_operand.vmem [shape: f32[1,32], index: 5, kind: input, shape index: {}]   ;;  %s886_s6 = inlined_call_operand.vmem [shape: f32[4,1,32], index: 6, kind: input, shape index: {}]   ;;  %s887_s7 = inlined_call_operand.hbm [shape: f32[4,8,32], index: 7, kind: output, shape index: {}]  }
   0x1   :  { %v29_v0 = vld [vmem:[%s880_s0 + $0x8] sm:$0xff]  ;;  %v30_v1 = vld [vmem:[%s880_s0 + $0x10] sm:$0xff]  ;;  %v28_v2 = vld [vmem:[%s880_s0] sm:$0xff] }
   0x2   :  { %v584_v3 = vpack.i.bf16 %v30_v1, %v29_v0  ;;  %v574_v4 = vpack.i.bf16 %v29_v0, %v28_v2  ;;  %v724_v5 = vld [vmem:[%s880_s0 + $0x18] sm:$0xff]  ;;  %v729_v6 = vld [vmem:[%s880_s0 + $0x20] sm:$0xff]  ;;  %v734_v7 = vld [vmem:[%s880_s0 + $0x30] sm:$0xff] }
   0x3   :  { %v35_v8 = vld [vmem:[%s880_s0 + $0x38] sm:$0xff]  ;;  %v742_v9 = vld [vmem:[%s880_s0 + $0x28] sm:$0xff]  ;;  %v589_v10 = vpack.i.bf16 %v729_v6, %v724_v5  ;;  %v579_v11 = vpack.i.bf16 %v724_v5, %v30_v1  ;;  %v634_v12 = vld [vmem:[%s881_s1] sm:$0x3f]  }
   0x4   :  { %585 = vrot.lane.b32.xlu1 %v584_v3, %s665_s17  ;;  %575 = vrot.lane.b32.xlu0 %v574_v4, %s666_s18  ;;  %v137_v13 = vsel %vm135_vm0, %v634_v12, 0  ;;  %v599_v14 = vpack.i.bf16 %v35_v8, %v734_v7  ;;  %v594_v15 = vpack.i.bf16 %v742_v9, %v729_v6 }
   0x5   :  { %566 = vmatprep.subr.msk.bf16.mxu0 %vm135_vm0, %v634_v12 }
   0x6   :  { %541 = vmatpush3.bf16.msra.mxu0 %v137_v13 }
   0x8   :  { %590 = vrot.lane.b32.xlu1 %v589_v10, %s665_s17  ;;  %580 = vrot.lane.b32.xlu0 %v579_v11, %s666_s18 }
   0x9   :  { %12 = vsyncpa [#allocation3], 0  ;;  %v667_v16 = vmov 0.0   ;;  %v604_v18 = vpack.i.bf16 %v734_v7, %v742_v9  ;;  %vm93_vm1 = vcmask 31744   ;;  %vm102_vm2 = vcmask 64512   ;;  %v635_v63 = vld [vmem:[%s884_s4 + $0x28] sm:$0xff]  }
   0xa   :  { %v609_v17 = vpack.i.bf16 %v667_v16, %v35_v8  ;;  %vm122_vm3 = vcmask 97280   ;;  %550 = vmatprep.subr.bf16.mxu1 %v635_v63  ;;  %vm204_vm4 = vcmask 261120   ;;  %s669_s10 = smov 64   ;;  %vm339_vm5 = vcmask 523264   ;;  %s670_s0 = smov [#allocation2]  }
   0xb   :  { %551 = vmatpush3.bf16.msra.mxu1 %v635_v63  ;;  %vm401_vm6 = vcmask 785408   ;;  %s498_s1 = sshll.u32 %s670_s0, 4  ;;  %s499_s1 = int_to_ptr.vmem [resolvable:$true] %s498_s1 }
   0xc   :  { %600 = vrot.lane.b32.xlu1 %v599_v14, %s666_s18  ;;  %595 = vrot.lane.b32.xlu0 %v594_v15, %s666_s18  ;;  %s643_s21 = scalar_lea.vmem %s499_s1, 512  ;;  %p648_p1 = scmp.lt.s32.totalorder %s499_s1, %s499_s1 }
   0xd   :  { %p644_p0 = scmp.ne.s32.totalorder %s499_s1, %s643_s21  ;;  %p649_p2 = scmp.lt.s32.totalorder %s643_s21, %s643_s21 }
   0xf   :  { %p650_p3 = por %p649_p2, %p648_p1 }
  0x10   :  { %610 = vrot.lane.b32.xlu1 %v609_v17, %s665_s17  ;;  %605 = vrot.lane.b32.xlu0 %v604_v18, %s665_s17 }
  0x11   :  { %p651_p4 = pnand %p650_p3, %p644_p0 }
  0x76   :  { %v586_v19 = vpop.permute.xlu1 %585  ;;  %v576_v20 = vpop.permute.xlu0 %575 }
  0x77   :  { %v588_v21 = vunpack.i.h.bf16 %v586_v19  ;;  %v587_v22 = vunpack.i.l.bf16 %v586_v19  ;;  %v578_v23 = vunpack.i.h.bf16 %v576_v20  ;;  %v577_v24 = vunpack.i.l.bf16 %v576_v20 }
  0x79   :  { %v94_v25 = vsel %vm93_vm1, 0.0, %v577_v24  ;;  %v95_v26 = vsel %vm93_vm1, %v28_v2, %v578_v23  ;;  %v638_v2 = vld [vmem:[%s884_s4 + $0x10] sm:$0xff]  }
  0x7a   :  { %v591_v27 = vpop.permute.xlu1 %590  ;;  %v581_v28 = vpop.permute.xlu0 %580  ;;  %v103_v29 = vsel %vm102_vm2, %v94_v25, %v587_v22  ;;  %v104_v30 = vsel %vm102_vm2, %v95_v26, %v588_v21 }
  0x7b   :  { %v593_v31 = vunpack.i.h.bf16 %v591_v27  ;;  %v592_v32 = vunpack.i.l.bf16 %v591_v27  ;;  %v583_v33 = vunpack.i.h.bf16 %v581_v28  ;;  %v582_v34 = vunpack.i.l.bf16 %v581_v28 }
  0x7c   :  { %v111_v35 = vpack.c.bf16 %v104_v30, %v103_v29 }
  0x7d   :  { %v97_v36 = vsel %vm93_vm1, %v30_v1, %v583_v33  ;;  %v96_v37 = vsel %vm93_vm1, %v29_v0, %v582_v34  ;;  %v636_v0 = vld [vmem:[%s884_s4 + $0x20] sm:$0xff]   ;;  %v637_v1 = vld [vmem:[%s884_s4 + $0x18] sm:$0xff]  }
  0x7e   :  { %542 = vmatprep.mubr.msk.bf16.mxu0 %vm122_vm3, %v111_v35  ;;  %v601_v38 = vpop.permute.xlu1 %600  ;;  %v596_v39 = vpop.permute.xlu0 %595  ;;  %v105_v40 = vsel %vm102_vm2, %v96_v37, %v592_v32  ;;  %v106_v41 = vsel %vm102_vm2, %v97_v36, %v593_v31  ;;  %552 = vmatprep.subr.bf16.mxu1 %v636_v0 }
  0x7f   :  { %v603_v42 = vunpack.i.h.bf16 %v601_v38  ;;  %v602_v43 = vunpack.i.l.bf16 %v601_v38  ;;  %v598_v44 = vunpack.i.h.bf16 %v596_v39  ;;  %v597_v45 = vunpack.i.l.bf16 %v596_v39  ;;  %553 = vmatpush3.bf16.msra.mxu1 %v636_v0 }
  0x80   :  { %v112_v46 = vpack.c.bf16 %v106_v41, %v105_v40  ;;  %554 = vmatprep.subr.bf16.mxu1 %v637_v1 }
  0x81   :  { %v101_v53 = vsel %vm93_vm1, %v734_v7, %v603_v42  ;;  %v100_v54 = vsel %vm93_vm1, %v742_v9, %v602_v43  ;;  %v99_v55 = vsel %vm93_vm1, %v729_v6, %v598_v44  ;;  %v98_v56 = vsel %vm93_vm1, %v724_v5, %v597_v45 }
  0x82   :  { %543 = vmatmul.mubr.msk.bf16.vlgmr.msra.gmra.mxu0 %vm122_vm3, %v112_v46  ;;  %v611_v47 = vpop.permute.xlu1 %610  ;;  %v606_v48 = vpop.permute.xlu0 %605 }
  0x83   :  { %v613_v49 = vunpack.i.h.bf16 %v611_v47  ;;  %v612_v50 = vunpack.i.l.bf16 %v611_v47  ;;  %v608_v51 = vunpack.i.h.bf16 %v606_v48  ;;  %v607_v52 = vunpack.i.l.bf16 %v606_v48  ;;  %555 = vmatpush3.bf16.msra.mxu1 %v637_v1 }
  0x84   :  { %556 = vmatprep.subr.bf16.mxu1 %v638_v2 }
  0x85   :  { %v109_v57 = vsel %vm102_vm2, %v100_v54, %v612_v50  ;;  %v110_v58 = vsel %vm102_vm2, %v101_v53, %v613_v49  ;;  %v107_v59 = vsel %vm102_vm2, %v98_v56, %v607_v52  ;;  %v108_v60 = vsel %vm102_vm2, %v99_v55, %v608_v51 }
  0x86   :  { %v114_v61 = vpack.c.bf16 %v110_v58, %v109_v57  ;;  %v113_v62 = vpack.c.bf16 %v108_v60, %v107_v59 }
  0x87   :  { %557 = vmatpush3.bf16.msra.mxu1 %v638_v2 }
  0x88   :  { %546 = vmatprep.mubr.msk.bf16.mxu0 %vm122_vm3, %v113_v62 }
  0x8a   :  { %547 = vmatmul.mubr.msk.bf16.gmra.mxu0 %vm122_vm3, %v114_v61 }
 0x142   :  { %v795_v3 = vpop.f32.mrf.mxu0 }
 0x143   :  { %v228_v8 = vmul.f32 %v795_v3, %v795_v3  ;;  %v208_v14 = vsel %vm204_vm4, %v795_v3, 0.0 }
 0x144   :  { %v797_v4 = vpop.f32.mrf.mxu0 }
 0x145   :  { %v226_v6 = vmul.f32 %v797_v4, %v797_v4  ;;  %v205_v9 = vsel %vm204_vm4, %v797_v4, 0.0  ;;  %v237_v21 = vsel %vm204_vm4, %v228_v8, 0.0 }
 0x146   :  { %v799_v5 = vpop.f32.mrf.mxu0 }
 0x147   :  { %v234_v15 = vsel %vm204_vm4, %v226_v6, 0.0  ;;  %v229_v16 = vmul.f32 %v799_v5, %v799_v5  ;;  %v210_v22 = vsel %vm204_vm4, %v799_v5, 0.0  ;;  %v268_v6 = vlaneseq }
 0x148   :  { %v803_v7 = vpop.f32.mrf.mxu0 }
 0x149   :  { %v206_v10 = vsel %vm204_vm4, %v803_v7, 0.0  ;;  %v227_v11 = vmul.f32 %v803_v7, %v803_v7  ;;  %v239_v27 = vsel %vm204_vm4, %v229_v16, 0.0  ;;  %v269_v8 = vshrl.u32 %v268_v6, 7 }
 0x14a   :  { %v207_v12 = vadd.f32 %v206_v10, %v205_v9  ;;  %v813_v13 = vpop.f32.mrf.mxu0  ;;  %v260_v9 = vld [vmem:[%s882_s2] sm:$0x1] }
 0x14b   :  { %v235_v17 = vsel %vm204_vm4, %v227_v11, 0.0  ;;  %v232_v32 = vmul.f32 %v813_v13, %v813_v13  ;;  %v216_v38 = vsel %vm204_vm4, %v813_v13, 0.0  ;;  %v270_v10 = vsub.s32 0, %v269_v8  ;;  %v525_v8 = vld [vmem:[%s886_s6 + $0x2] ss:$0 sm:$0xff] }
 0x14c   :  { %v209_v18 = vadd.f32 %v208_v14, %v207_v12  ;;  %v236_v19 = vadd.f32 %v235_v17, %v234_v15  ;;  %v189_v20 = vpop.f32.mrf.mxu0  ;;  %v264_v14 = vld [vmem:[%s883_s3] sm:$0x1]  ;;  %v639_v17 = vld [vmem:[%s884_s4 + $0x8] sm:$0xff]  }
 0x14d   :  { %v230_v23 = vmul.f32 %v189_v20, %v189_v20  ;;  %v212_v28 = vsel %vm204_vm4, %v189_v20, 0.0  ;;  %v245_v43 = vsel %vm204_vm4, %v232_v32, 0.0  ;;  %558 = vmatprep.subr.bf16.mxu1 %v639_v17 }
 0x14e   :  { %v238_v24 = vadd.f32 %v237_v21, %v236_v19  ;;  %v211_v25 = vadd.f32 %v210_v22, %v209_v18  ;;  %v549_v26 = vpop.f32.mrf.mxu0  ;;  %559 = vmatpush3.bf16.msra.mxu1 %v639_v17 }
 0x14f   :  { %v241_v33 = vsel %vm204_vm4, %v230_v23, 0.0  ;;  %v233_v39 = vmul.f32 %v549_v26, %v549_v26  ;;  %v218_v44 = vsel %vm204_vm4, %v549_v26, 0.0 }
 0x150   :  { %v213_v29 = vadd.f32 %v212_v28, %v211_v25  ;;  %v240_v30 = vadd.f32 %v239_v27, %v238_v24  ;;  %v192_v31 = vpop.f32.mrf.mxu0 }
 0x151   :  { %v214_v34 = vsel %vm204_vm4, %v192_v31, 0.0  ;;  %v231_v35 = vmul.f32 %v192_v31, %v192_v31  ;;  %v247_v47 = vsel %vm204_vm4, %v233_v39, 0.0 }
 0x152   :  { %v242_v36 = vadd.f32 %v241_v33, %v240_v30  ;;  %v215_v37 = vadd.f32 %v214_v34, %v213_v29  ;;  %v640_v30 = vld [vmem:[%s884_s4] sm:$0xff]   ;;  %s668_s4 = smov 32  }
 0x153   :  { %v243_v40 = vsel %vm204_vm4, %v231_v35, 0.0  ;;  %560 = vmatprep.subr.bf16.mxu1 %v640_v30 }
 0x154   :  { %v217_v41 = vadd.f32 %v216_v38, %v215_v37  ;;  %v244_v42 = vadd.f32 %v243_v40, %v242_v36  ;;  %561 = vmatpush3.bf16.msra.mxu1 %v640_v30 }
 0x156   :  { %v219_v45 = vadd.f32 %v218_v44, %v217_v41  ;;  %v246_v46 = vadd.f32 %v245_v43, %v244_v42 }
 0x158   :  { %v220_v48 = vrot.slane %v219_v45, 4  ;;  %v248_v49 = vadd.f32 %v247_v47, %v246_v46 }
 0x15a   :  { %v221_v50 = vadd.f32 %v220_v48, %v219_v45  ;;  %v249_v51 = vrot.slane %v248_v49, 4 }
 0x15c   :  { %v222_v52 = vrot.slane %v221_v50, 2  ;;  %v250_v53 = vadd.f32 %v249_v51, %v248_v49 }
 0x15e   :  { %v223_v54 = vadd.f32 %v222_v52, %v221_v50  ;;  %v251_v55 = vrot.slane %v250_v53, 2 }
 0x160   :  { %v224_v56 = vrot.slane %v223_v54, 1  ;;  %v252_v57 = vadd.f32 %v251_v55, %v250_v53 }
 0x162   :  { %v225_v58 = vadd.f32 %v224_v56, %v223_v54  ;;  %v253_v59 = vrot.slane %v252_v57, 1 }
 0x164   :  { %v254_v60 = vadd.f32 %v253_v59, %v252_v57  ;;  %v255_v61 = vmul.f32 0.015625, %v225_v58 }
 0x166   :  { %v256_v62 = vmul.f32 0.015625, %v254_v60  ;;  %v257_v63 = vmul.f32 %v255_v61, %v255_v61 }
 0x168   :  { %v258_v0 = vsub.f32 %v256_v62, %v257_v63 }
 0x16a   :  { %v259_v1 = vmax.f32 %v258_v0, 0.0 }
 0x16c   :  { %v261_v2 = vadd.f32 1e-05, %v259_v1 }
 0x16e   :  { %641 = vrsqrt.f32 %v261_v2  ;;  %v514_v2 = vld [vmem:[%s885_s5] ss:$0 sm:$0xff] }
 0x17b   :  { %v642_v11 = vpop.eup %641 }
 0x17c   :  { %v263_v12 = vmul.f32 %v642_v11, %v260_v9  ;;  %v523_v11 = vld [vmem:[%s886_s6] ss:$0 sm:$0xff] }
 0x17e   :  { %v265_v15 = vmul.f32 %v263_v12, %v255_v61  ;;  %v271_v16 = vrot.slane %v263_v12, %v270_v10 }
 0x180   :  { %v266_v18 = vsub.f32 %v264_v14, %v265_v15  ;;  %v278_v19 = vmul.f32 %v271_v16, %v192_v31  ;;  %v277_v22 = vmul.f32 %v271_v16, %v189_v20  ;;  %v279_v23 = vmul.f32 %v813_v13, %v271_v16 }
 0x181   :  { %v273_v24 = vmul.f32 %v271_v16, %v797_v4  ;;  %v275_v25 = vmul.f32 %v795_v3, %v271_v16  ;;  %v280_v27 = vmul.f32 %v549_v26, %v271_v16  ;;  %v274_v28 = vmul.f32 %v271_v16, %v803_v7 }
 0x182   :  { %v285_v21 = vrot.slane %v266_v18, %v270_v10  ;;  %v276_v29 = vmul.f32 %v799_v5, %v271_v16  ;;  %v526_v16 = vld [vmem:[%s886_s6 + $0x3] ss:$0 sm:$0xff] }
 0x184   :  { %v292_v31 = vadd.f32 %v285_v21, %v278_v19  ;;  %v291_v32 = vadd.f32 %v285_v21, %v277_v22  ;;  %v293_v33 = vadd.f32 %v285_v21, %v279_v23  ;;  %v287_v20 = vadd.f32 %v285_v21, %v273_v24 }
 0x185   :  { %v289_v34 = vadd.f32 %v285_v21, %v275_v25  ;;  %v294_v13 = vadd.f32 %v285_v21, %v280_v27  ;;  %v288_v35 = vadd.f32 %v285_v21, %v274_v28  ;;  %v290_v4 = vadd.f32 %v285_v21, %v276_v29  ;;  %v524_v21 = vld [vmem:[%s886_s6 + $0x1] ss:$0 sm:$0xff] }
 0x186   :  { %v299_v36 = vmax.f32 %v291_v32, 0.0  ;;  %v301_v3 = vmax.f32 %v293_v33, 0.0  ;;  %v295_v26 = vmax.f32 %v287_v20, 0.0  ;;  %v300_v37 = vmax.f32 %v292_v31, 0.0 }
 0x187   :  { %v297_v7 = vmax.f32 %v289_v34, 0.0  ;;  %v302_v38 = vmax.f32 %v294_v13, 0.0  ;;  %v296_v40 = vmax.f32 %v288_v35, 0.0  ;;  %v298_v41 = vmax.f32 %v290_v4, 0.0 }
 0x188   :  { %v619_v5 = vpack.i.bf16 %v301_v3, %v299_v36 }
 0x189   :  { %v614_v39 = vpack.i.bf16 %v297_v7, %v295_v26  ;;  %v629_v42 = vpack.i.bf16 %v302_v38, %v300_v37  ;;  %v624_v43 = vpack.i.bf16 %v298_v41, %v296_v40 }
 0x18a   :  { %620 = vrot.lane.b32.xlu1 %v619_v5, %s668_s4 }
 0x18b   :  { %615 = vrot.lane.b32.xlu0 %v614_v39, %s668_s4 }
 0x18e   :  { %630 = vrot.lane.b32.xlu1 %v629_v42, %s669_s10 }
 0x18f   :  { %625 = vrot.lane.b32.xlu0 %v624_v43, %s669_s10 }
 0x1fc   :  { %v621_v44 = vpop.permute.xlu1 %620 }
 0x1fd   :  { %v616_v45 = vpop.permute.xlu0 %615  ;;  %v623_v46 = vunpack.i.h.bf16 %v621_v44  ;;  %v622_v47 = vunpack.i.l.bf16 %v621_v44 }
 0x1fe   :  { %v618_v48 = vunpack.i.h.bf16 %v616_v45  ;;  %v617_v49 = vunpack.i.l.bf16 %v616_v45 }
 0x1ff   :  { %v338_v54 = vsel %vm204_vm4, %v300_v37, %v623_v46  ;;  %v337_v55 = vsel %vm204_vm4, %v298_v41, %v622_v47 }
 0x200   :  { %v631_v50 = vpop.permute.xlu1 %630  ;;  %v335_v58 = vsel %vm204_vm4, 0.0, %v617_v49  ;;  %v336_v61 = vsel %vm204_vm4, %v296_v40, %v618_v48 }
 0x201   :  { %v633_v51 = vunpack.i.h.bf16 %v631_v50  ;;  %v632_v52 = vunpack.i.l.bf16 %v631_v50  ;;  %v626_v53 = vpop.permute.xlu0 %625 }
 0x202   :  { %v628_v56 = vunpack.i.h.bf16 %v626_v53  ;;  %v627_v57 = vunpack.i.l.bf16 %v626_v53 }
 0x203   :  { %v342_v59 = vsel %vm339_vm5, %v337_v55, %v632_v52  ;;  %v343_v60 = vsel %vm339_vm5, %v338_v54, %v633_v51 }
 0x204   :  { %v345_v62 = vpack.c.bf16 %v343_v60, %v342_v59  ;;  %v340_v63 = vsel %vm339_vm5, %v335_v58, %v627_v57  ;;  %v341_v0 = vsel %vm339_vm5, %v336_v61, %v628_v56 }
 0x205   :  { %v344_v1 = vpack.c.bf16 %v341_v0, %v340_v63 }
 0x207   :  { %562 = vmatprep.mubr.msk.bf16.mxu1 %vm401_vm6, %v344_v1 }
 0x208   :  { %563 = vmatmul.mubr.msk.bf16.vlgmr.msra.gmra.mxu1 %vm401_vm6, %v345_v62 }
 0x2c8   :  { %v564_v6 = vpop.f32.mrf.mxu1 }
 0x2c9   :  { %v451_v9 = vadd.f32 %v564_v6, %v514_v2 }
 0x2ca   :  { %v442_v10 = vpop.f32.mrf.mxu1 }
 0x2cb   :  { %v487_v12 = vadd.f32 %v525_v8, %v451_v9  ;;  %v443_v14 = vadd.f32 %v514_v2, %v442_v10 }
 0x2cc   :  { %v565_v15 = vpop.f32.mrf.mxu1 }
 0x2cd   :  { %491 = vst.msk [vmem:[#allocation2 + $0x10] sm:$0xff] %vm204_vm4, %v487_v12  ;;  %v485_v17 = vadd.f32 %v523_v11, %v443_v14  ;;  %v454_v18 = vadd.f32 %v565_v15, %v514_v2 }
 0x2ce   :  { %v445_v19 = vpop.f32.mrf.mxu1 }
 0x2cf   :  { %489 = vst.msk [vmem:[#allocation2] sm:$0xff] %vm204_vm4, %v485_v17  ;;  %v488_v22 = vadd.f32 %v526_v16, %v454_v18  ;;  %v446_v23 = vadd.f32 %v514_v2, %v445_v19 }
 0x2d1   :  { %492 = vst.msk [vmem:[#allocation2 + $0x18] sm:$0xff] %vm204_vm4, %v488_v22  ;;  %v486_v24 = vadd.f32 %v524_v21, %v446_v23 }
 0x2d3   :  { %490 = vst.msk [vmem:[#allocation2 + $0x8] sm:$0xff] %vm204_vm4, %v486_v24 }
 0x2d4   :  { %654 = shalt.err (!%p651_p4)
}
 0x2d5   :  { %s671_s6 = smov 128  }
 0x2d6   :  { %504 = dma.vmem_to_hbm [thread:$0]  %s499_s1, 512, %s887_s7, [#allocation3], %s671_s6, %s671_s6, %s665_s17  }
 0x2d7   :  { %663 = dma.done.wait [#allocation3], 512  }
 0x2d8   :  { %664 = vsyncadd [#allocation3], 4294966784 }
 0x2d9   :  { %508 = vsyncpa [#allocation3], 1 }

</bundles_post_ra>
